<compile_context>
chip_gen: v6e
topology: v6e:2x2x1
jax: 0.10.0
libtpu: 0.0.40
codegen_flags: <defaults>
</compile_context>

<pallas_src>
import functools

import jax
import jax.numpy as jnp
from jax.experimental import pallas as pl
from jax.experimental.pallas import tpu as pltpu


def _mlp_kernel(w1t_ref, b1_ref, w2_ref, b2_ref, x_ref, o_ref):
    """One batch tile, transposed layout.

    w1t_ref: [H, D]   (VMEM, resident across grid steps)
    b1_ref : [H, 1]
    w2_ref : [H, 1]
    b2_ref : [1, 1]
    x_ref  : [D, TB]  (batch on the lane axis)
    o_ref  : [1, TB]
    """
    xt = x_ref[...]                                                   # [D, TB]
    # Layer 1 on the MXU: lane-dense [H, TB] result.
    h = jnp.dot(w1t_ref[...], xt, preferred_element_type=jnp.float32)  # [H, TB]
    h = jnp.tanh(h + b1_ref[...])                                     # bias lane-broadcast, EUP tanh
    # Layer 2 on the VPU: weighted sublane reduce instead of a N=1 matmul.
    y = jnp.sum(h * w2_ref[...], axis=0, keepdims=True) + b2_ref[...]  # [1, TB]
    o_ref[...] = y.astype(o_ref.dtype)


@functools.partial(jax.jit, static_argnames=("tb",))
def distributed_net_forward(x, w1, b1, w2, b2, *, tb=256):
    """x: [B, input_size] float32.  w1: [D, H], b1: [1, H] (or [H]),
    w2: [H, 1], b2: [1, 1] (or [1]).  Returns [B, 1] float32 (PyTorch semantics)."""
    B, D = x.shape
    H = w1.shape[1]          # 10
    assert tb % 128 == 0, "batch tile must be lane-dense (multiple of 128)"

    # Lane-dense, transposed layout: batch on the lane axis, padded to a tile multiple.
    Bp = ((B + tb - 1) // tb) * tb
    xt = jnp.pad(x.T, ((0, 0), (0, Bp - B)))                  # [D, Bp]
    w1t = w1.T.astype(jnp.float32)                            # [H, D]
    b1c = jnp.reshape(b1, (H, 1)).astype(jnp.float32)         # [H, 1]
    w2c = jnp.reshape(w2, (H, 1)).astype(jnp.float32)         # [H, 1]
    b2c = jnp.reshape(b2, (1, 1)).astype(jnp.float32)         # [1, 1]

    grid = (Bp // tb,)
    yt = pl.pallas_call(
        _mlp_kernel,
        out_shape=jax.ShapeDtypeStruct((1, Bp), jnp.float32),
        grid=grid,
        in_specs=[
            # Weights/biases: full-array blocks, constant index_map -> DMA'd once, VMEM-resident.
            pl.BlockSpec((H, D), lambda i: (0, 0)),
            pl.BlockSpec((H, 1), lambda i: (0, 0)),
            pl.BlockSpec((H, 1), lambda i: (0, 0)),
            pl.BlockSpec((1, 1), lambda i: (0, 0)),
            # Activations: tiled over batch (lane axis), double-buffered by the pipeline.
            pl.BlockSpec((D, tb), lambda i: (0, i)),
        ],
        out_specs=pl.BlockSpec((1, tb), lambda i: (0, i)),
        compiler_params=pltpu.CompilerParams(
            dimension_semantics=("parallel",),   # megacore sharding on v7x
        ),
        cost_estimate=pl.CostEstimate(
            flops=2 * Bp * (D * H + H),
            transcendentals=Bp * H,
            bytes_accessed=4 * (D * Bp + Bp + H * D + 2 * H + 1),
        ),
    )(w1t, b1c, w2c, b2c, xt)

    # Back to PyTorch layout: [B, 1].
    return yt[0, :B].reshape(B, 1)


def init_params(key, input_size, hidden=10, out=1):
    """Deterministic init mimicking torch.nn.Linear's U(-1/sqrt(fan_in), 1/sqrt(fan_in))."""
    k1, k2, k3, k4 = jax.random.split(key, 4)
    bnd1 = 1.0 / jnp.sqrt(input_size)
    bnd2 = 1.0 / jnp.sqrt(hidden)
    w1 = jax.random.uniform(k1, (input_size, hidden), jnp.float32, -bnd1, bnd1)
    b1 = jax.random.uniform(k2, (1, hidden), jnp.float32, -bnd1, bnd1)
    w2 = jax.random.uniform(k3, (hidden, out), jnp.float32, -bnd2, bnd2)
    b2 = jax.random.uniform(k4, (1, out), jnp.float32, -bnd2, bnd2)
    return w1, b1, w2, b2


if __name__ == "__main__":
    key = jax.random.PRNGKey(0)
    kx, kp = jax.random.split(key)

    # Batched-inference shape (many agents / timesteps per call); not a multiple of the tile
    # so the padding path is exercised too.
    batch = 1000
    input_size = 14   # e.g. Thymio proximity/ground sensor vector

    x = jax.random.normal(kx, (batch, input_size), dtype=jnp.float32)
    w1, b1, w2, b2 = init_params(kp, input_size)

    out = distributed_net_forward(x, w1, b1, w2, b2, tb=256)
    out = jax.block_until_ready(out)

    # Pure-JAX reference check of the forward semantics.
    ref = jnp.tanh(x @ w1 + b1) @ w2 + b2
    assert out.shape == (batch, 1)
    assert jnp.allclose(out, ref, atol=1e-4, rtol=1e-4), float(jnp.max(jnp.abs(out - ref)))

    print("KERNEL_OK")
</pallas_src>

<mosaic_0001>
module attributes {stable_mosaic.version = 11 : i64} {
  func.func @_mlp_kernel(%arg0: i32, %arg1: memref<10x14xf32, #tpu.memory_space<vmem>>, %arg2: memref<10x1xf32, #tpu.memory_space<vmem>>, %arg3: memref<10x1xf32, #tpu.memory_space<vmem>>, %arg4: memref<1x1xf32, #tpu.memory_space<vmem>>, %arg5: memref<14x256xf32, #tpu.memory_space<vmem>>, %arg6: memref<1x256xf32, #tpu.memory_space<vmem>>) attributes {dimension_semantics = [#tpu.dimension_semantics<parallel>], iteration_bounds = array<i64: 4>, scalar_prefetch = 0 : i64, scratch_operands = 0 : i64, tpu.core_type = #tpu.core_type<tc>, window_params = [{pipeline_mode = #tpu.pipeline_mode<synchronous>, transform_indices = @transform_0, window_bounds = array<i64: 10, 14>}, {pipeline_mode = #tpu.pipeline_mode<synchronous>, transform_indices = @transform_1, window_bounds = array<i64: 10, 1>}, {pipeline_mode = #tpu.pipeline_mode<synchronous>, transform_indices = @transform_2, window_bounds = array<i64: 10, 1>}, {pipeline_mode = #tpu.pipeline_mode<synchronous>, transform_indices = @transform_3, window_bounds = array<i64: 1, 1>}, {transform_indices = @transform_4, window_bounds = array<i64: 14, 256>}, {transform_indices = @transform_5, window_bounds = array<i64: 1, 256>}]} {
    %c0 = arith.constant 0 : index
    %c0_0 = arith.constant 0 : index
    %0 = vector.load %arg5[%c0, %c0_0] : memref<14x256xf32, #tpu.memory_space<vmem>>, vector<14x256xf32>
    %c0_1 = arith.constant 0 : index
    %c0_2 = arith.constant 0 : index
    %1 = vector.load %arg1[%c0_1, %c0_2] : memref<10x14xf32, #tpu.memory_space<vmem>>, vector<10x14xf32>
    %cst = arith.constant dense<0.000000e+00> : vector<10x256xf32>
    %2 = tpu.matmul %1, %0, %cst {dimension_numbers = #tpu.dot_dimension_numbers<[1], [0], [0], [1], [0, 0, 1, 1], [], []>} : vector<10x14xf32>, vector<14x256xf32>, vector<10x256xf32> -> vector<10x256xf32>
    %c0_3 = arith.constant 0 : index
    %c0_4 = arith.constant 0 : index
    %3 = vector.load %arg2[%c0_3, %c0_4] : memref<10x1xf32, #tpu.memory_space<vmem>>, vector<10x1xf32>
    %4 = vector.broadcast %3 : vector<10x1xf32> to vector<10x256xf32>
    %5 = arith.addf %2, %4 : vector<10x256xf32>
    %6 = math.tanh %5 : vector<10x256xf32>
    %c0_5 = arith.constant 0 : index
    %c0_6 = arith.constant 0 : index
    %7 = vector.load %arg3[%c0_5, %c0_6] : memref<10x1xf32, #tpu.memory_space<vmem>>, vector<10x1xf32>
    %8 = vector.broadcast %7 : vector<10x1xf32> to vector<10x256xf32>
    %9 = arith.mulf %6, %8 : vector<10x256xf32>
    %cst_7 = arith.constant dense<0.000000e+00> : vector<256xf32>
    %10 = vector.multi_reduction <add>, %9, %cst_7 [0] : vector<10x256xf32> to vector<256xf32>
    %11 = vector.shape_cast %10 : vector<256xf32> to vector<1x256xf32>
    %c0_8 = arith.constant 0 : index
    %c0_9 = arith.constant 0 : index
    %12 = vector.load %arg4[%c0_8, %c0_9] : memref<1x1xf32, #tpu.memory_space<vmem>>, vector<1x1xf32>
    %13 = vector.broadcast %12 : vector<1x1xf32> to vector<1x256xf32>
    %14 = arith.addf %11, %13 : vector<1x256xf32>
    %c0_10 = arith.constant 0 : index
    %c0_11 = arith.constant 0 : index
    %15 = vector.load %arg6[%c0_10, %c0_11] : memref<1x256xf32, #tpu.memory_space<vmem>>, vector<1x256xf32>
    tpu.vector_store %arg6[%c0_10, %c0_11], %14 {strides = array<i32>} : memref<1x256xf32, #tpu.memory_space<vmem>>, vector<1x256xf32>,
    return
  }
  func.func @transform_0(%arg0: i32) -> (i32, i32) {
    %c0_i32 = arith.constant 0 : i32
    %c0_i32_0 = arith.constant 0 : i32
    %c0_i32_1 = arith.constant 0 : i32
    return %c0_i32, %c0_i32_0 : i32, i32
  }
  func.func @transform_1(%arg0: i32) -> (i32, i32) {
    %c0_i32 = arith.constant 0 : i32
    %c0_i32_0 = arith.constant 0 : i32
    %c0_i32_1 = arith.constant 0 : i32
    return %c0_i32, %c0_i32_0 : i32, i32
  }
  func.func @transform_2(%arg0: i32) -> (i32, i32) {
    %c0_i32 = arith.constant 0 : i32
    %c0_i32_0 = arith.constant 0 : i32
    %c0_i32_1 = arith.constant 0 : i32
    return %c0_i32, %c0_i32_0 : i32, i32
  }
  func.func @transform_3(%arg0: i32) -> (i32, i32) {
    %c0_i32 = arith.constant 0 : i32
    %c0_i32_0 = arith.constant 0 : i32
    %c0_i32_1 = arith.constant 0 : i32
    return %c0_i32, %c0_i32_0 : i32, i32
  }
  func.func @transform_4(%arg0: i32) -> (i32, i32) {
    %c0_i32 = arith.constant 0 : i32
    %c0_i32_0 = arith.constant 0 : i32
    return %c0_i32, %arg0 : i32, i32
  }
  func.func @transform_5(%arg0: i32) -> (i32, i32) {
    %c0_i32 = arith.constant 0 : i32
    %c0_i32_0 = arith.constant 0 : i32
    return %c0_i32, %arg0 : i32, i32
  }
}

</mosaic_0001>

<bundles_post_ra>
// kernel: distributed_net_forward.1
= control target key start
LH: loop header
LB: loop body
LE: loop exit
PB: predicated region body
PF: predicated region fallthrough
CT: control target
= control target key end

     0   :  { %s682_s0 = inlined_call_operand.vmem [shape: f32[10,14], index: 0, kind: input, shape index: {}]   ;;  %s683_s1 = inlined_call_operand.vmem [shape: f32[10,1], index: 1, kind: input, shape index: {}]   ;;  %s684_s2 = inlined_call_operand.vmem [shape: f32[10,1], index: 2, kind: input, shape index: {}]   ;;  %s685_s3 = inlined_call_operand.<no memory space> [shape: f32[1,1], index: 3, kind: input, shape index: {}]   ;;  %s686_s4 = inlined_call_operand.vmem [shape: f32[14,1024], index: 4, kind: input, shape index: {}]   ;;  %s687_s5 = inlined_call_operand.vmem [shape: f32[1,1024], index: 5, kind: output, shape index: {}]  }
   0x1   :  { %v10_v0 = vstv %s685_s3 }
   0x2   :  { %11 = vst [vmem:[#allocation2] sm:$0x1] %v10_v0 }
   0x3   :  { %s608_s20 = smov 0   ;;  %s610_s21 = smov 0  }
   0x4   :  { %s612_s22 = smov 0  }
   0x5 LB: > { %s490_s3 = sadd.s32 4294967295, %s570_s22   ;;  %s625_s23 = sadd.s32 1, %s570_s22   ;;  %s570_s22 = sphi %s612_s22, %s690_s22   ;;  %s566_s21 = sphi %s610_s21, %s689_s21   ;;  %s562_s20 = sphi %s608_s20, %s688_s20  }
   0x6   : > { %s105_s24 = ssub.s32 %s570_s22, %s625_s23  ;;  %s108_s25 = sadd.s32 1, %s566_s21 }
   0x7   : > { %p106_p0 = scmp.eq.s32.totalorder %s105_s24, 0  ;;  %p115_p1 = scmp.ne.s32.totalorder %s566_s21, %s562_s20 }
   0x8   : > { %p116_p2 = scmp.eq.s32.totalorder %s570_s22, 0  ;;  %p493_p4 = scmp.ge.s32.totalorder %s570_s22, 4 }
   0x9   : > { %s634_s26 = scalar_select %p106_p0, %s566_s21, %s108_s25  }
   0xa   : > { %p117_p3 = por %p116_p2, %p115_p1  ;;  %179 = sbr.rel (%p493_p4) target bundleno = 21 (0x15), region = 32 }
   0xf   : > { %182 = sbr.rel (!%p117_p3) target bundleno = 21 (0x15), region = 36  ;;  %s184_s27 = sand.u32 (%p117_p3), 1, %s566_s21  }
  0x10   : > { %s506_s28 = sshll.u32 (%p117_p3), %s570_s22, 4  ;;  %s494_s29 = sshll.u32 (%p117_p3), %s184_s27, 5 }
  0x11   : > { %s189_s7 = scalar_lea.vmem (%p117_p3), %s686_s4, %s506_s28  ;;  %s186_s8 = scalar_lea.vmem (%p117_p3), [#allocation3], %s494_s29 }
  0x12   : > { %v202_v1 = vld [vmem:[%s189_s7] sm:$0xff] (%p117_p3)  ;;  %v204_v2 = vld [vmem:[%s189_s7 + $0x8] sm:$0xff] (%p117_p3) }
  0x13   : > { %v206_v3 = vld [vmem:[%s189_s7 + $0x40] sm:$0xff] (%p117_p3)  ;;  %203 = vst [vmem:[%s186_s8] sm:$0xff] (%p117_p3), %v202_v1  ;;  %205 = vst [vmem:[%s186_s8 + $0x8] sm:$0xff] (%p117_p3), %v204_v2  ;;  %v208_v4 = vld [vmem:[%s189_s7 + $0x48] sm:$0xff] (%p117_p3) }
  0x14   : > { %207 = vst [vmem:[%s186_s8 + $0x10] sm:$0xff] %v206_v3  ;;  %209 = vst [vmem:[%s186_s8 + $0x18] sm:$0xff] %v208_v4 }
  0x15 PF: > { %p497_p5 = scmp.ge.s32.totalorder %s570_s22, 1  ;;  %p214_p6 = scmp.lt.s32.totalorder %s570_s22, 5 }
  0x17   : > { %p215_p7 = pnand %p497_p5, %p214_p6 }
  0x18   : > { %s221_s9 = sand.u32 (!%p215_p7), 1, %s562_s20   ;;  %s499_s28 = sshll.u32 (!%p215_p7), %s490_s3, 1 }
  0x19   : > { %218 = sbr.rel (%p215_p7) target bundleno = 276 (0x114), region = 59  ;;  %s498_s10 = sshll.u32 (!%p215_p7), %s221_s9, 5 }
  0x1a   : > { %s223_s15 = scalar_lea.vmem (!%p215_p7), [#allocation3], %s498_s10  ;;  %p249_p8 = scmp.lt.s32.totalorder (!%p215_p7), %s499_s28, 7 }
  0x1e   : > { %vm278_vm0 = vcmask 1045504   ;;  %v572_v5 = vmov 0.0   ;;  %v260_v6 = vld [vmem:[%s683_s1 + $0x8] sm:$0x3]  ;;  %v573_v7 = vmov 0   ;;  %v257_v13 = vld [vmem:[%s682_s0] sm:$0xff]  ;;  %v405_v41 = vlaneseq }
  0x1f   : > { %349 = vmatprep.mubr.f32.mxu0 %v572_v5  ;;  %355 = vmatprep.mubr.f32.mxu1 %v572_v5  ;;  %v367_v8 = vld [vmem:[%s684_s2 + $0x8] sm:$0x3]  ;;  %v256_v9 = vld [vmem:[%s223_s15 + $0x18] sm:$0x3f]  ;;  %v255_v10 = vld [vmem:[%s223_s15 + $0x10] sm:$0x3f] }
  0x20   : > { %538 = vset.pattern.permute.xlu0 %v573_v7  ;;  %539 = vset.pattern.permute.xlu1 %v573_v7  ;;  %v254_v11 = vld [vmem:[%s223_s15 + $0x8] sm:$0xff]  ;;  %v253_v12 = vld [vmem:[%s223_s15] sm:$0xff]  ;;  %vm271_vm1 = vcmask 113664   ;;  %v399_v17 = vld [vmem:[#allocation2] sm:$0x1]  ;;  %vm382_vm2 = vcmask 1041408  }
  0x21   : > { %268 = vperm.xlu0 %538, %v260_v6   ;;  %375 = vperm.xlu1 %539, %v367_v8   ;;  %v258_v14 = vld [vmem:[%s682_s0 + $0x8] sm:$0x3]  ;;  %v259_v15 = vld [vmem:[%s683_s1] sm:$0xff]  ;;  %v406_v46 = vshrl.u32 %v405_v41, 7  ;;  %v574_v49 = vmov 1966171168  }
  0x22   : > { %500 = vmatprep.subr.msk.mxu0 %vm278_vm0, %v256_v9  ;;  %507 = vmatprep.subr.msk.mxu1 %vm278_vm0, %v256_v9  ;;  %v366_v16 = vld [vmem:[%s684_s2] sm:$0xff]  ;;  %v415_v50 = vunpack.c.l.s4 %v574_v49  ;;  %s692_s28 = smov (!%p249_p8, %s499_s28), 7  ;;  %vm431_vm3 = vcmp.lt.s32.totalorder %v405_v41, 256 }
  0x23   : > { %501 = vmatpush1.msk.msra.mxu0 %vm278_vm0, %v255_v10  ;;  %509 = vmatpush1.msk.msra.mxu1 %vm278_vm0, %v255_v10  ;;  %v407_v53 = vsub.s32 0, %v406_v46  ;;  %s251_s22 = scalar_lea.vmem %s687_s5, %s692_s28 }
  0x24   : > { %315 = vmatprep.subr.mxu0 %v254_v11  ;;  %508 = vmatprep.subr.mxu1 %v254_v11  ;;  %v416_v57 = vunpack.c.0.s8 %v415_v50 }
  0x25   : > { %316 = vmatpush1.msra.mxu0 %v253_v12  ;;  %510 = vmatpush1.msra.mxu1 %v253_v12 }
  0x26   : > { %502 = vmatmul.mubr.msk.f32.vlgmr.msra.gmra.mxu0 %vm271_vm1, %v257_v13  ;;  %503 = vmatmul.mubr.msk.f32.vlgmr.msra.gmra.mxu1 %vm271_vm1, %v258_v14  ;;  %v419_v62 = vsub.s32 %v416_v57, %v406_v46 }
  0x27   : > { %263 = vperm.xlu0 %538, %v259_v15   ;;  %370 = vperm.xlu1 %539, %v366_v16  }
  0x2b   : > { %402 = vperm.xlu0 %538, %v399_v17  }
  0x9c   : > { %v269_v18 = vpop.permute.xlu0 %268  ;;  %v376_v28 = vpop.permute.xlu1 %375 }
  0xa2   : > { %v264_v19 = vpop.permute.xlu0 %263  ;;  %v371_v29 = vpop.permute.xlu1 %370 }
  0xa6   : > { %v403_v56 = vpop.permute.xlu0 %402 }
  0xa7   : > { %v408_v60 = vrot.slane %v403_v56, %v407_v53 }
  0xe6   : > { %v351_v20 = vpop.f32.mrf.mxu0  ;;  %v357_v21 = vpop.f32.mrf.mxu1 }
  0xe7   : > { %v352_v22 = vadd.f32 %v351_v20, %v264_v19  ;;  %v358_v23 = vadd.f32 %v357_v21, %v269_v18 }
  0xe8   : > { %v353_v24 = vpop.f32.mrf.mxu0  ;;  %v359_v25 = vpop.f32.mrf.mxu1 }
  0xe9   : > { %540 = vtanh.f32 %v352_v22  ;;  %v354_v26 = vadd.f32 %v353_v24, %v264_v19  ;;  %v360_v27 = vadd.f32 %v359_v25, %v269_v18 }
  0xea   : > { %542 = vtanh.f32 %v358_v23 }
  0xeb   : > { %544 = vtanh.f32 %v354_v26 }
  0xec   : > { %546 = vtanh.f32 %v360_v27 }
  0xf6   : > { %v541_v30 = vpop.eup %540 }
  0xf7   : > { %v543_v31 = vpop.eup %542  ;;  %v378_v32 = vmul.f32 %v541_v30, %v371_v29 }
  0xf8   : > { %v545_v33 = vpop.eup %544  ;;  %v380_v34 = vmul.f32 %v543_v31, %v376_v28 }
  0xf9   : > { %v547_v35 = vpop.eup %546  ;;  %v379_v36 = vmul.f32 %v545_v33, %v371_v29 }
  0xfa   : > { %v381_v37 = vmul.f32 %v547_v35, %v376_v28  ;;  %v383_v38 = vsel %vm382_vm2, %v380_v34, 0.0 }
  0xfb   : > { %v384_v39 = vadd.f32 %v383_v38, %v378_v32 }
  0xfc   : > { %v391_v40 = vsel %vm382_vm2, %v381_v37, 0.0 }
  0xfd   : > { %v385_v42 = vrot.slane %v384_v39, 4  ;;  %v392_v43 = vadd.f32 %v391_v40, %v379_v36 }
  0xff   : > { %v386_v44 = vadd.f32 %v385_v42, %v384_v39  ;;  %v393_v45 = vrot.slane %v392_v43, 4 }
 0x101   : > { %v387_v47 = vrot.slane %v386_v44, 2  ;;  %v394_v48 = vadd.f32 %v393_v45, %v392_v43 }
 0x103   : > { %v388_v51 = vadd.f32 %v387_v47, %v386_v44  ;;  %v395_v52 = vrot.slane %v394_v48, 2 }
 0x105   : > { %v389_v54 = vrot.slane %v388_v51, 1  ;;  %v396_v55 = vadd.f32 %v395_v52, %v394_v48 }
 0x107   : > { %v390_v58 = vadd.f32 %v389_v54, %v388_v51  ;;  %v397_v59 = vrot.slane %v396_v55, 1 }
 0x109   : > { %v398_v61 = vadd.f32 %v397_v59, %v396_v55  ;;  %v409_v63 = vadd.f32 %v408_v60, %v390_v58 }
 0x10b   : > { %v410_v0 = vadd.f32 %v408_v60, %v398_v61 }
 0x10d   : > { %v413_v1 = vcombine.low %v409_v63, %v410_v0 }
 0x10f   : > { %v420_v2 = vrot.slane %v413_v1, %v419_v62 }
 0x111   : > { %v427_v3 = vrot.slane %v420_v2, %v419_v62 }
 0x113   : > { %433 = vst.msk [vmem:[%s251_s22] sm:$0x3] %vm431_vm3, %v427_v3 }
 0x114 PF: > { %p14_p9 = scmp.ge.s32.totalorder %s625_s23, 6   ;;  %s688_s20 = smov %s566_s21 }
 0x115   : > { %s689_s21 = smov %s634_s26  ;;  %s690_s22 = smov %s625_s23 }
 0x116   :  { %16 = sbr.rel (!%p14_p9) target bundleno = 5 (0x5), region = 98 }

</bundles_post_ra>
